<compile_context>
chip_gen: v7x
topology: tpu7x:2x2x1
jax: 0.10.0
libtpu: 0.0.40
codegen_flags: <defaults>
</compile_context>

<pallas_src>
import functools
import math

import jax
import jax.numpy as jnp
from jax.experimental import pallas as pl
from jax.experimental.pallas import tpu as pltpu


def _round_up(x: int, m: int) -> int:
    return (x + m - 1) // m * m


def _fused_mlp_kernel(x_ref, *refs, num_layers, negative_slope, eps):
    """Fused forward for one row block.

    x_ref:  (TILE_M, in_f)        activations (bf16 on the fast path)
    refs:   per layer (w, b, gamma, beta) refs, then o_ref:
        w:     (in_f, out_f)      pre-transposed weight (bf16 or f32)
        b:     (1, out_f)         bias (f32)
        gamma: (1, out_f)         LayerNorm scale (f32)
        beta:  (1, out_f)         LayerNorm shift (f32)
    o_ref:  (TILE_M, out_f)       f32 output
    """
    param_refs = refs[:-1]
    o_ref = refs[-1]

    h = x_ref[...]  # already in the matmul dtype -> goes straight to the MXU
    for layer in range(num_layers):
        w_ref, b_ref, g_ref, be_ref = param_refs[4 * layer: 4 * layer + 4]

        # Linear: MXU matmul with f32 accumulation (h already matches w dtype for layer 0;
        # later layers cast the small f32 LN output once).
        y = jnp.dot(h.astype(w_ref.dtype), w_ref[...],
                    preferred_element_type=jnp.float32)
        y = y + b_ref[...]

        # LeakyReLU (valid for 0 <= negative_slope < 1): single mul + max.
        y = jnp.maximum(y, negative_slope * y)

        # LayerNorm over the exact (unpadded) feature width, two-pass (centered) variance.
        mean = jnp.mean(y, axis=-1, keepdims=True)
        d = y - mean
        var = jnp.mean(d * d, axis=-1, keepdims=True)
        h = d * jax.lax.rsqrt(var + eps) * g_ref[...] + be_ref[...]

    o_ref[...] = h.astype(o_ref.dtype)


def prepare_mlp_params(params, *, use_bf16_matmul=True):
    """One-time prep (call ONCE, outside the forward): transpose W to (in, out) and cast to the
    matmul dtype; reshape bias / LayerNorm affine params to (1, out_f) f32.
    `params` is a list of (W, b, gamma, beta) with W in the PyTorch nn.Linear layout
    (out_features, in_features)."""
    mm_dtype = jnp.bfloat16 if use_bf16_matmul else jnp.float32
    flat = []
    for (w, b, g, be) in params:
        flat += [
            jnp.asarray(w, jnp.float32).T.astype(mm_dtype),      # (in_f, out_f)
            jnp.asarray(b, jnp.float32).reshape(1, -1),
            jnp.asarray(g, jnp.float32).reshape(1, -1),
            jnp.asarray(be, jnp.float32).reshape(1, -1),
        ]
    return flat


def mlp_forward(x, flat_params, *, negative_slope=0.01, eps=1e-5,
                tile_m=None, use_bf16_matmul=True):
    """Run the fused MLP. `flat_params` comes from prepare_mlp_params()."""
    n, in_f = x.shape
    assert len(flat_params) % 4 == 0
    num_layers = len(flat_params) // 4
    assert flat_params[0].shape[0] == in_f, "x width must match first layer in_features"
    out_f = flat_params[-4].shape[1]
    mm_dtype = jnp.bfloat16 if use_bf16_matmul else jnp.float32

    # bf16 input stream: halves the dominant HBM read and the x VMEM block.
    x_mm = x.astype(mm_dtype)

    # Row tiling: big tiles for DMA efficiency, but >=2 grid steps when the batch allows so
    # both TensorCores get work on v7x.
    if tile_m is None:
        tile_m = min(1024, _round_up(n, 8))
        if pl.cdiv(n, tile_m) < 2 and n > 8:
            tile_m = _round_up(pl.cdiv(n, 2), 8)

    grid = (pl.cdiv(n, tile_m),)  # partial last block handled by Pallas (masked writes)

    # Input specs: x tiled over rows at its TRUE width; params resident (constant index_map),
    # all at their exact shapes (block == full array dims is legal regardless of (8,128)).
    in_specs = [pl.BlockSpec((tile_m, in_f), lambda i: (i, 0))]
    for li in range(num_layers):
        wt = flat_params[4 * li]
        ip, op = wt.shape
        in_specs += [
            pl.BlockSpec((ip, op), lambda i: (0, 0)),  # W^T
            pl.BlockSpec((1, op), lambda i: (0, 0)),   # bias
            pl.BlockSpec((1, op), lambda i: (0, 0)),   # gamma
            pl.BlockSpec((1, op), lambda i: (0, 0)),   # beta
        ]
    out_specs = pl.BlockSpec((tile_m, out_f), lambda i: (i, 0))

    # Explicit VMEM budget: double-buffered x/out blocks + resident params + f32-intermediate
    # headroom, clamped well below physical VMEM (64 MiB on v7x).
    x_bytes = 2 if use_bf16_matmul else 4
    param_bytes = sum(int(p.size) * p.dtype.itemsize for p in flat_params)
    max_width = max([in_f] + [flat_params[4 * li].shape[1] for li in range(num_layers)])
    vmem_need = (2 * tile_m * in_f * x_bytes
                 + 2 * tile_m * out_f * 4
                 + 2 * param_bytes
                 + 8 * tile_m * max_width * 4)
    vmem_limit = int(min(max(vmem_need, 16 * 1024 * 1024), 48 * 1024 * 1024))

    kernel = functools.partial(
        _fused_mlp_kernel,
        num_layers=num_layers,
        negative_slope=negative_slope,
        eps=eps,
    )

    out = pl.pallas_call(
        kernel,
        out_shape=jax.ShapeDtypeStruct((n, out_f), jnp.float32),
        grid=grid,
        in_specs=in_specs,
        out_specs=out_specs,
        compiler_params=pltpu.CompilerParams(
            dimension_semantics=("parallel",),
            vmem_limit_bytes=vmem_limit,
        ),
    )(x_mm, *flat_params)

    return out


# ---------------------------------------------------------------------------
# Parameter construction (mimics PyTorch nn.Linear / nn.LayerNorm defaults)
# ---------------------------------------------------------------------------
def init_linear_params(key, in_f, out_f):
    """W, b ~ U(-1/sqrt(in_f), 1/sqrt(in_f)), W in (out_f, in_f) layout."""
    k_w, k_b = jax.random.split(key)
    bound = 1.0 / math.sqrt(in_f)
    w = jax.random.uniform(k_w, (out_f, in_f), jnp.float32, -bound, bound)
    b = jax.random.uniform(k_b, (out_f,), jnp.float32, -bound, bound)
    return w, b


def build_mlp_params(key, in_features, latent_dimension, num_layers):
    params = []
    prev = in_features
    for _ in range(num_layers):
        key, sub = jax.random.split(key)
        w, b = init_linear_params(sub, prev, latent_dimension)
        gamma = jnp.ones((latent_dimension,), jnp.float32)   # LayerNorm defaults
        beta = jnp.zeros((latent_dimension,), jnp.float32)
        params.append((w, b, gamma, beta))
        prev = latent_dimension
    return params


def mlp_reference(x, params, *, negative_slope=0.01, eps=1e-5, use_bf16_matmul=True):
    """Pure-JAX reference with the same bf16 matmul operands (for a sanity check)."""
    mm_dtype = jnp.bfloat16 if use_bf16_matmul else jnp.float32
    h = x.astype(jnp.float32)
    for (w, b, g, be) in params:
        y = jnp.dot(h.astype(mm_dtype), w.T.astype(mm_dtype),
                    preferred_element_type=jnp.float32) + b
        y = jnp.where(y >= 0, y, negative_slope * y)
        mean = jnp.mean(y, axis=-1, keepdims=True)
        var = jnp.mean((y - mean) ** 2, axis=-1, keepdims=True)
        h = (y - mean) * jax.lax.rsqrt(var + eps) * g + be
    return h


if __name__ == "__main__":
    # TODO(synk): nn.Dropout (p=0.0) and spectral_norm are disabled in this config;
    # they are identity / absent at forward time and therefore not emitted.
    key = jax.random.PRNGKey(0)
    k_x, k_p = jax.random.split(key)

    batch = 8
    in_features = 16
    latent_dimension = 32
    num_layers = 2

    x = jax.random.normal(k_x, (batch, in_features), jnp.float32)
    params = build_mlp_params(k_p, in_features, latent_dimension, num_layers)

    # One-time parameter preparation (hoisted out of the per-call forward path).
    flat_params = prepare_mlp_params(params)

    out = mlp_forward(x, flat_params)
    out = jax.block_until_ready(out)

    assert out.shape == (batch, latent_dimension)
    assert out.dtype == jnp.float32

    ref = mlp_reference(x, params)
    assert bool(jnp.all(jnp.isfinite(out)))
    assert bool(jnp.max(jnp.abs(out - ref)) < 5e-2), "mismatch vs reference"

    print("KERNEL_OK")
</pallas_src>

<mosaic_0001>
module attributes {stable_mosaic.version = 11 : i64} {
  func.func @_fused_mlp_kernel(%arg0: i32, %arg1: memref<8x16xbf16, #tpu.memory_space<vmem>>, %arg2: memref<16x32xbf16, #tpu.memory_space<vmem>>, %arg3: memref<1x32xf32, #tpu.memory_space<vmem>>, %arg4: memref<1x32xf32, #tpu.memory_space<vmem>>, %arg5: memref<1x32xf32, #tpu.memory_space<vmem>>, %arg6: memref<32x32xbf16, #tpu.memory_space<vmem>>, %arg7: memref<1x32xf32, #tpu.memory_space<vmem>>, %arg8: memref<1x32xf32, #tpu.memory_space<vmem>>, %arg9: memref<1x32xf32, #tpu.memory_space<vmem>>, %arg10: memref<8x32xf32, #tpu.memory_space<vmem>>) attributes {dimension_semantics = [#tpu.dimension_semantics<parallel>], iteration_bounds = array<i64: 1>, scalar_prefetch = 0 : i64, scratch_operands = 0 : i64, tpu.core_type = #tpu.core_type<tc>, window_params = [{transform_indices = @transform_0, window_bounds = array<i64: 8, 16>}, {pipeline_mode = #tpu.pipeline_mode<synchronous>, transform_indices = @transform_1, window_bounds = array<i64: 16, 32>}, {pipeline_mode = #tpu.pipeline_mode<synchronous>, transform_indices = @transform_2, window_bounds = array<i64: 1, 32>}, {pipeline_mode = #tpu.pipeline_mode<synchronous>, transform_indices = @transform_3, window_bounds = array<i64: 1, 32>}, {pipeline_mode = #tpu.pipeline_mode<synchronous>, transform_indices = @transform_4, window_bounds = array<i64: 1, 32>}, {pipeline_mode = #tpu.pipeline_mode<synchronous>, transform_indices = @transform_5, window_bounds = array<i64: 32, 32>}, {pipeline_mode = #tpu.pipeline_mode<synchronous>, transform_indices = @transform_6, window_bounds = array<i64: 1, 32>}, {pipeline_mode = #tpu.pipeline_mode<synchronous>, transform_indices = @transform_7, window_bounds = array<i64: 1, 32>}, {pipeline_mode = #tpu.pipeline_mode<synchronous>, transform_indices = @transform_8, window_bounds = array<i64: 1, 32>}, {transform_indices = @transform_9, window_bounds = array<i64: 8, 32>}]} {
    %c0 = arith.constant 0 : index
    %c0_0 = arith.constant 0 : index
    %0 = vector.load %arg1[%c0, %c0_0] : memref<8x16xbf16, #tpu.memory_space<vmem>>, vector<8x16xbf16>
    %c0_1 = arith.constant 0 : index
    %c0_2 = arith.constant 0 : index
    %1 = vector.load %arg2[%c0_1, %c0_2] : memref<16x32xbf16, #tpu.memory_space<vmem>>, vector<16x32xbf16>
    %cst = arith.constant dense<0.000000e+00> : vector<8x32xf32>
    %2 = tpu.matmul %0, %1, %cst {dimension_numbers = #tpu.dot_dimension_numbers<[1], [0], [0], [1], [0, 0, 1, 1], [], []>} : vector<8x16xbf16>, vector<16x32xbf16>, vector<8x32xf32> -> vector<8x32xf32>
    %c0_3 = arith.constant 0 : index
    %c0_4 = arith.constant 0 : index
    %3 = vector.load %arg3[%c0_3, %c0_4] : memref<1x32xf32, #tpu.memory_space<vmem>>, vector<1x32xf32>
    %4 = vector.broadcast %3 : vector<1x32xf32> to vector<8x32xf32>
    %5 = arith.addf %2, %4 : vector<8x32xf32>
    %cst_5 = arith.constant 0.00999999977 : f32
    %6 = vector.broadcast %cst_5 : f32 to vector<8x32xf32>
    %7 = arith.mulf %6, %5 : vector<8x32xf32>
    %8 = arith.maximumf %5, %7 : vector<8x32xf32>
    %cst_6 = arith.constant dense<0.000000e+00> : vector<8xf32>
    %9 = vector.multi_reduction <add>, %8, %cst_6 [1] : vector<8x32xf32> to vector<8xf32>
    %10 = vector.shape_cast %9 : vector<8xf32> to vector<8x1xf32>
    %cst_7 = arith.constant 3.200000e+01 : f32
    %11 = vector.broadcast %cst_7 : f32 to vector<8x1xf32>
    %12 = arith.divf %10, %11 : vector<8x1xf32>
    %13 = vector.broadcast %12 : vector<8x1xf32> to vector<8x32xf32>
    %14 = arith.subf %8, %13 : vector<8x32xf32>
    %15 = arith.mulf %14, %14 : vector<8x32xf32>
    %cst_8 = arith.constant dense<0.000000e+00> : vector<8xf32>
    %16 = vector.multi_reduction <add>, %15, %cst_8 [1] : vector<8x32xf32> to vector<8xf32>
    %17 = vector.shape_cast %16 : vector<8xf32> to vector<8x1xf32>
    %cst_9 = arith.constant 3.200000e+01 : f32
    %18 = vector.broadcast %cst_9 : f32 to vector<8x1xf32>
    %19 = arith.divf %17, %18 : vector<8x1xf32>
    %cst_10 = arith.constant 9.99999974E-6 : f32
    %20 = vector.broadcast %cst_10 : f32 to vector<8x1xf32>
    %21 = arith.addf %19, %20 : vector<8x1xf32>
    %22 = math.rsqrt %21 : vector<8x1xf32>
    %23 = vector.broadcast %22 : vector<8x1xf32> to vector<8x32xf32>
    %24 = arith.mulf %14, %23 : vector<8x32xf32>
    %c0_11 = arith.constant 0 : index
    %c0_12 = arith.constant 0 : index
    %25 = vector.load %arg4[%c0_11, %c0_12] : memref<1x32xf32, #tpu.memory_space<vmem>>, vector<1x32xf32>
    %26 = vector.broadcast %25 : vector<1x32xf32> to vector<8x32xf32>
    %27 = arith.mulf %24, %26 : vector<8x32xf32>
    %c0_13 = arith.constant 0 : index
    %c0_14 = arith.constant 0 : index
    %28 = vector.load %arg5[%c0_13, %c0_14] : memref<1x32xf32, #tpu.memory_space<vmem>>, vector<1x32xf32>
    %29 = vector.broadcast %28 : vector<1x32xf32> to vector<8x32xf32>
    %30 = arith.addf %27, %29 : vector<8x32xf32>
    %31 = arith.truncf %30 : vector<8x32xf32> to vector<8x32xbf16>
    %c0_15 = arith.constant 0 : index
    %c0_16 = arith.constant 0 : index
    %32 = vector.load %arg6[%c0_15, %c0_16] : memref<32x32xbf16, #tpu.memory_space<vmem>>, vector<32x32xbf16>
    %cst_17 = arith.constant dense<0.000000e+00> : vector<8x32xf32>
    %33 = tpu.matmul %31, %32, %cst_17 {dimension_numbers = #tpu.dot_dimension_numbers<[1], [0], [0], [1], [0, 0, 1, 1], [], []>} : vector<8x32xbf16>, vector<32x32xbf16>, vector<8x32xf32> -> vector<8x32xf32>
    %c0_18 = arith.constant 0 : index
    %c0_19 = arith.constant 0 : index
    %34 = vector.load %arg7[%c0_18, %c0_19] : memref<1x32xf32, #tpu.memory_space<vmem>>, vector<1x32xf32>
    %35 = vector.broadcast %34 : vector<1x32xf32> to vector<8x32xf32>
    %36 = arith.addf %33, %35 : vector<8x32xf32>
    %cst_20 = arith.constant 0.00999999977 : f32
    %37 = vector.broadcast %cst_20 : f32 to vector<8x32xf32>
    %38 = arith.mulf %37, %36 : vector<8x32xf32>
    %39 = arith.maximumf %36, %38 : vector<8x32xf32>
    %cst_21 = arith.constant dense<0.000000e+00> : vector<8xf32>
    %40 = vector.multi_reduction <add>, %39, %cst_21 [1] : vector<8x32xf32> to vector<8xf32>
    %41 = vector.shape_cast %40 : vector<8xf32> to vector<8x1xf32>
    %cst_22 = arith.constant 3.200000e+01 : f32
    %42 = vector.broadcast %cst_22 : f32 to vector<8x1xf32>
    %43 = arith.divf %41, %42 : vector<8x1xf32>
    %44 = vector.broadcast %43 : vector<8x1xf32> to vector<8x32xf32>
    %45 = arith.subf %39, %44 : vector<8x32xf32>
    %46 = arith.mulf %45, %45 : vector<8x32xf32>
    %cst_23 = arith.constant dense<0.000000e+00> : vector<8xf32>
    %47 = vector.multi_reduction <add>, %46, %cst_23 [1] : vector<8x32xf32> to vector<8xf32>
    %48 = vector.shape_cast %47 : vector<8xf32> to vector<8x1xf32>
    %cst_24 = arith.constant 3.200000e+01 : f32
    %49 = vector.broadcast %cst_24 : f32 to vector<8x1xf32>
    %50 = arith.divf %48, %49 : vector<8x1xf32>
    %cst_25 = arith.constant 9.99999974E-6 : f32
    %51 = vector.broadcast %cst_25 : f32 to vector<8x1xf32>
    %52 = arith.addf %50, %51 : vector<8x1xf32>
    %53 = math.rsqrt %52 : vector<8x1xf32>
    %54 = vector.broadcast %53 : vector<8x1xf32> to vector<8x32xf32>
    %55 = arith.mulf %45, %54 : vector<8x32xf32>
    %c0_26 = arith.constant 0 : index
    %c0_27 = arith.constant 0 : index
    %56 = vector.load %arg8[%c0_26, %c0_27] : memref<1x32xf32, #tpu.memory_space<vmem>>, vector<1x32xf32>
    %57 = vector.broadcast %56 : vector<1x32xf32> to vector<8x32xf32>
    %58 = arith.mulf %55, %57 : vector<8x32xf32>
    %c0_28 = arith.constant 0 : index
    %c0_29 = arith.constant 0 : index
    %59 = vector.load %arg9[%c0_28, %c0_29] : memref<1x32xf32, #tpu.memory_space<vmem>>, vector<1x32xf32>
    %60 = vector.broadcast %59 : vector<1x32xf32> to vector<8x32xf32>
    %61 = arith.addf %58, %60 : vector<8x32xf32>
    %c0_30 = arith.constant 0 : index
    %c0_31 = arith.constant 0 : index
    %62 = vector.load %arg10[%c0_30, %c0_31] : memref<8x32xf32, #tpu.memory_space<vmem>>, vector<8x32xf32>
    tpu.vector_store %arg10[%c0_30, %c0_31], %61 {strides = array<i32>} : memref<8x32xf32, #tpu.memory_space<vmem>>, vector<8x32xf32>,
    return
  }
  func.func @transform_0(%arg0: i32) -> (i32, i32) {
    %c0_i32 = arith.constant 0 : i32
    %c0_i32_0 = arith.constant 0 : i32
    return %arg0, %c0_i32 : i32, i32
  }
  func.func @transform_1(%arg0: i32) -> (i32, i32) {
    %c0_i32 = arith.constant 0 : i32
    %c0_i32_0 = arith.constant 0 : i32
    %c0_i32_1 = arith.constant 0 : i32
    return %c0_i32, %c0_i32_0 : i32, i32
  }
  func.func @transform_2(%arg0: i32) -> (i32, i32) {
    %c0_i32 = arith.constant 0 : i32
    %c0_i32_0 = arith.constant 0 : i32
    %c0_i32_1 = arith.constant 0 : i32
    return %c0_i32, %c0_i32_0 : i32, i32
  }
  func.func @transform_3(%arg0: i32) -> (i32, i32) {
    %c0_i32 = arith.constant 0 : i32
    %c0_i32_0 = arith.constant 0 : i32
    %c0_i32_1 = arith.constant 0 : i32
    return %c0_i32, %c0_i32_0 : i32, i32
  }
  func.func @transform_4(%arg0: i32) -> (i32, i32) {
    %c0_i32 = arith.constant 0 : i32
    %c0_i32_0 = arith.constant 0 : i32
    %c0_i32_1 = arith.constant 0 : i32
    return %c0_i32, %c0_i32_0 : i32, i32
  }
  func.func @transform_5(%arg0: i32) -> (i32, i32) {
    %c0_i32 = arith.constant 0 : i32
    %c0_i32_0 = arith.constant 0 : i32
    %c0_i32_1 = arith.constant 0 : i32
    return %c0_i32, %c0_i32_0 : i32, i32
  }
  func.func @transform_6(%arg0: i32) -> (i32, i32) {
    %c0_i32 = arith.constant 0 : i32
    %c0_i32_0 = arith.constant 0 : i32
    %c0_i32_1 = arith.constant 0 : i32
    return %c0_i32, %c0_i32_0 : i32, i32
  }
  func.func @transform_7(%arg0: i32) -> (i32, i32) {
    %c0_i32 = arith.constant 0 : i32
    %c0_i32_0 = arith.constant 0 : i32
    %c0_i32_1 = arith.constant 0 : i32
    return %c0_i32, %c0_i32_0 : i32, i32
  }
  func.func @transform_8(%arg0: i32) -> (i32, i32) {
    %c0_i32 = arith.constant 0 : i32
    %c0_i32_0 = arith.constant 0 : i32
    %c0_i32_1 = arith.constant 0 : i32
    return %c0_i32, %c0_i32_0 : i32, i32
  }
  func.func @transform_9(%arg0: i32) -> (i32, i32) {
    %c0_i32 = arith.constant 0 : i32
    %c0_i32_0 = arith.constant 0 : i32
    return %arg0, %c0_i32 : i32, i32
  }
}

</mosaic_0001>

<bundles_post_ra>
// kernel: tpu_custom_call.1
= control target key start
LH: loop header
LB: loop body
LE: loop exit
PB: predicated region body
PF: predicated region fallthrough
CT: control target
= control target key end

     0   :  { %14 = vsyncpa [#allocation3], 0  ;;  %s551_s0 = inlined_call_operand.hbm [shape: bf16[8,16], index: 0, kind: input, shape index: {}]   ;;  %s552_s1 = inlined_call_operand.hbm [shape: bf16[16,32], index: 1, kind: input, shape index: {}]   ;;  %s553_s2 = inlined_call_operand.vmem [shape: f32[1,32], index: 2, kind: input, shape index: {}]   ;;  %s554_s3 = inlined_call_operand.vmem [shape: f32[1,32], index: 3, kind: input, shape index: {}]   ;;  %s555_s4 = inlined_call_operand.hbm [shape: f32[1,32], index: 4, kind: input, shape index: {}]   ;;  %s556_s5 = inlined_call_operand.vmem [shape: bf16[32,32], index: 5, kind: input, shape index: {}]   ;;  %s557_s6 = inlined_call_operand.vmem [shape: f32[1,32], index: 6, kind: input, shape index: {}]   ;;  %s558_s7 = inlined_call_operand.vmem [shape: f32[1,32], index: 7, kind: input, shape index: {}]   ;;  %s559_s8 = inlined_call_operand.vmem [shape: f32[1,32], index: 8, kind: input, shape index: {}]   ;;  %s560_s9 = inlined_call_operand.hbm [shape: f32[8,32], index: 9, kind: output, shape index: {}]  }
   0x1   :  { %15 = vsyncpa [#allocation6], 0 }
   0x2   :  { %16 = vsyncpa [#allocation4], 0  ;;  %s418_s30 = smov [#allocation5]   ;;  %s324_s13 = scalar_lea.hbm %s552_s1, 128 }
   0x3   :  { %s32_s10 = sshll.u32 %s418_s30, 4  ;;  %p325_p0 = scmp.ne.s32.totalorder %s552_s1, %s324_s13  ;;  %s33_s10 = int_to_ptr.vmem [resolvable:$true] %s32_s10 }
   0x4   :  { %p328_p1 = scmp.lt.u32.totalorder %s324_s13, %s552_s1 }
   0x6   :  { %p330_p2 = pnand %p328_p1, %p325_p0 }
   0x8   :  { %333 = shalt.err (!%p330_p2)
}
   0x9   :  { %s334_s18 = scalar_lea.vmem %s33_s10, 128  ;;  %p339_p4 = scmp.lt.s32.totalorder %s33_s10, %s33_s10 }
   0xa   :  { %p335_p3 = scmp.ne.s32.totalorder %s33_s10, %s334_s18  ;;  %p340_p5 = scmp.lt.s32.totalorder %s334_s18, %s334_s18 }
   0xc   :  { %p341_p6 = por %p340_p5, %p339_p4 }
   0xe   :  { %p342_p7 = pnand %p341_p6, %p335_p3 }
  0x10   :  { %345 = shalt.err (!%p342_p7)
}
  0x11   :  { %s419_s19 = smov 64   ;;  %s420_s20 = smov 4  }
  0x12   :  { %38 = dma.hbm_to_vmem [thread:$0]  %s552_s1, 128, %s33_s10, [#allocation6], %s419_s19, %s419_s19, %s420_s20  }
  0x13   :  { %s421_s23 = smov [#allocation2]   ;;  %s422_s25 = smov [#allocation7]  }
  0x14   :  { %s23_s24 = sshll.u32 %s421_s23, 4  ;;  %s49_s26 = sshll.u32 %s422_s25, 4  ;;  %s24_s24 = int_to_ptr.vmem [resolvable:$true] %s23_s24  ;;  %s50_s26 = int_to_ptr.vmem [resolvable:$true] %s49_s26 }
  0x15   :  { %s346_s29 = scalar_lea.hbm %s551_s0, 64 }
  0x16   :  { %p347_p8 = scmp.ne.s32.totalorder %s551_s0, %s346_s29  ;;  %p350_p9 = scmp.lt.u32.totalorder %s346_s29, %s551_s0 }
  0x18   :  { %p352_p10 = pnand %p350_p9, %p347_p8 }
  0x1a   :  { %355 = shalt.err (!%p352_p10)
}
  0x1b   :  { %s356_s1 = scalar_lea.vmem %s24_s24, 64  ;;  %p361_p12 = scmp.lt.s32.totalorder %s24_s24, %s24_s24 }
  0x1c   :  { %p357_p11 = scmp.ne.s32.totalorder %s24_s24, %s356_s1  ;;  %p362_p13 = scmp.lt.s32.totalorder %s356_s1, %s356_s1 }
  0x1e   :  { %p363_p0 = por %p362_p13, %p361_p12 }
  0x20   :  { %p364_p1 = pnand %p363_p0, %p357_p11 }
  0x22   :  { %367 = shalt.err (!%p364_p1)
}
  0x23   :  { %26 = dma.hbm_to_vmem [thread:$0]  %s551_s0, 64, %s24_s24, [#allocation3]  }
  0x24   :  { %s368_s17 = scalar_lea.hbm %s555_s4, 16 }
  0x25   :  { %p369_p2 = scmp.ne.s32.totalorder %s555_s4, %s368_s17  ;;  %p372_p3 = scmp.lt.u32.totalorder %s368_s17, %s555_s4 }
  0x27   :  { %p374_p4 = pnand %p372_p3, %p369_p2 }
  0x29   :  { %377 = shalt.err (!%p374_p4)
}
  0x2a   :  { %s378_s22 = scalar_lea.vmem %s50_s26, 16  ;;  %s382_s23 = scalar_lea.vmem %s50_s26, 32 }
  0x2b   :  { %p379_p5 = scmp.ne.s32.totalorder %s50_s26, %s378_s22  ;;  %p383_p6 = scmp.lt.s32.totalorder %s50_s26, %s50_s26 }
  0x2c   :  { %p384_p7 = scmp.lt.s32.totalorder %s382_s23, %s378_s22 }
  0x2e   :  { %p385_p8 = por %p384_p7, %p383_p6 }
  0x30   :  { %p386_p9 = pnand %p385_p8, %p379_p5 }
  0x32   :  { %389 = shalt.err (!%p386_p9)
}
  0x33   :  { %52 = dma.hbm_to_vmem [thread:$0]  %s555_s4, 16, %s50_s26, [#allocation6]  }
  0x34   :  { %412 = dma.done.wait [#allocation3], 64  }
  0x35   :  { %413 = vsyncadd [#allocation3], 4294967232 }
  0x36   :  { %414 = dma.done.wait [#allocation6], 144  }
  0x37   :  { %415 = vsyncadd [#allocation6], 4294967152  ;;  %v423_v0 = vmov 0.0   ;;  %vm424_vm0 = vmmov 0   ;;  %v317_v1 = vld [vmem:[#allocation5] sm:$0xff]   ;;  %vm87_vm1 = vcmask 130048  }
  0x38   :  { %295 = vmatprep.subr.bf16.mxu0 %v423_v0  ;;  %297 = vmatprep.mubr.msk.bf16.mxu0 %vm424_vm0, %v423_v0  ;;  %v71_v2 = vld [vmem:[#allocation2] sm:$0xf]  ;;  %v279_v3 = vld [vmem:[%s553_s2] ss:$0 sm:$0xff]  ;;  %vm133_vm2 = vcmask 261120   ;;  %v319_v18 = vld [vmem:[%s556_s5 + $0x8] sm:$0xff]  }
  0x39   :  { %301 = vmatprep.subr.bf16.mxu1 %v423_v0  ;;  %305 = vmatprep.mubr.msk.bf16.mxu1 %vm424_vm0, %v423_v0  ;;  %v318_v17 = vld [vmem:[%s556_s5] sm:$0xff]   ;;  %v283_v25 = vld [vmem:[#allocation7] ss:$0 sm:$0xff]  ;;  %s425_s1 = smov [#allocation8]  }
  0x3a   :  { %296 = vmatpush3.bf16.msra.mxu0 %v317_v1  ;;  %302 = vmatpush3.bf16.msra.mxu1 %v318_v17  ;;  %v282_v23 = vld [vmem:[%s554_s3] ss:$0 sm:$0xff]  ;;  %s269_s10 = sshll.u32 %s425_s1, 4  ;;  %s270_s10 = int_to_ptr.vmem [resolvable:$true] %s269_s10 }
  0x3b   :  { %303 = vmatprep.subr.bf16.mxu1 %v423_v0  ;;  %v284_v29 = vld [vmem:[%s557_s6] ss:$0 sm:$0xff]  ;;  %s390_s14 = scalar_lea.vmem %s270_s10, 128  ;;  %p395_p11 = scmp.lt.s32.totalorder %s270_s10, %s270_s10 }
  0x3c   :  { %v288_v47 = vld [vmem:[%s558_s7] ss:$0 sm:$0xff]  ;;  %p391_p10 = scmp.ne.s32.totalorder %s270_s10, %s390_s14  ;;  %p396_p12 = scmp.lt.s32.totalorder %s390_s14, %s390_s14 }
  0x3d   :  { %298 = vmatmul.mubr.msk.bf16.vlgmr.msra.gmra.mrb[0].mxu0 %vm87_vm1, %v71_v2  ;;  %v289_v49 = vld [vmem:[%s559_s8] ss:$0 sm:$0xff] }
  0x3e   :  { %304 = vmatpush3.bf16.msra.mxu1 %v319_v18  ;;  %p397_p13 = por %p396_p12, %p395_p11 }
  0x40   :  { %p398_p0 = pnand %p397_p13, %p391_p10 }
 0x110   :  { %v125_v4 = vpop.f32.mrb[0].mxu0 }
 0x111   :  { %v126_v5 = vadd.f32 %v279_v3, %v125_v4  ;;  %v299_v6 = vpop.f32.mrb[1].mxu0 }
 0x112   :  { %v128_v7 = vpop.f32.mrb[2].mxu0 }
 0x113   :  { %v131_v8 = vmul.f32 0.01, %v126_v5  ;;  %v300_v9 = vpop.f32.mrb[3].mxu0 }
 0x115   :  { %v132_v10 = vmax.f32 %v126_v5, %v131_v8 }
 0x117   :  { %v134_v11 = vsel %vm133_vm2, %v132_v10, 0.0 }
 0x118   :  { %135 = vadd.xlane.f32.xlu0 %v134_v11 }
 0x1a5   :  { %v136_v12 = vpop.xlane.xlu0 %135 }
 0x1a6   :  { %v138_v13 = vmul.f32 0.03125, %v136_v12 }
 0x1a8   :  { %v139_v14 = vsub.f32 %v132_v10, %v138_v13 }
 0x1aa   :  { %v140_v15 = vmul.f32 %v139_v14, %v139_v14 }
 0x1ac   :  { %v141_v16 = vsel %vm133_vm2, %v140_v15, 0.0 }
 0x1ad   :  { %142 = vadd.xlane.f32.xlu0 %v141_v16 }
 0x23a   :  { %v143_v19 = vpop.xlane.xlu0 %142 }
 0x23b   :  { %v144_v20 = vmul.f32 0.03125, %v143_v19 }
 0x23d   :  { %v145_v21 = vadd.f32 1e-05, %v144_v20 }
 0x23f   :  { %320 = vrsqrt.f32 %v145_v21 }
 0x249   :  { %v321_v22 = vpop.eup %320 }
 0x24a   :  { %v147_v24 = vmul.f32 %v321_v22, %v139_v14 }
 0x24c   :  { %v155_v26 = vmul.f32 %v282_v23, %v147_v24 }
 0x24e   :  { %v163_v27 = vadd.f32 %v283_v25, %v155_v26 }
 0x250   :  { %v164_v28 = vpack.c.bf16 %v163_v27, %v163_v27 }
 0x252   :  { %306 = vmatmul.mubr.msk.bf16.vlgmr.msra.gmra.mrb[0].mxu1 %vm133_vm2, %v164_v28 }
 0x325   :  { %v225_v30 = vpop.f32.mrb[0].mxu1 }
 0x326   :  { %v226_v31 = vadd.f32 %v284_v29, %v225_v30  ;;  %v307_v32 = vpop.f32.mrb[1].mxu1 }
 0x327   :  { %v228_v33 = vpop.f32.mrb[2].mxu1 }
 0x328   :  { %v231_v34 = vmul.f32 0.01, %v226_v31  ;;  %v308_v35 = vpop.f32.mrb[3].mxu1 }
 0x32a   :  { %v232_v36 = vmax.f32 %v226_v31, %v231_v34 }
 0x32c   :  { %v233_v37 = vsel %vm133_vm2, %v232_v36, 0.0 }
 0x32d   :  { %234 = vadd.xlane.f32.xlu1 %v233_v37 }
 0x3ba   :  { %v235_v38 = vpop.xlane.xlu1 %234 }
 0x3bb   :  { %v236_v39 = vmul.f32 0.03125, %v235_v38 }
 0x3bd   :  { %v237_v40 = vsub.f32 %v232_v36, %v236_v39 }
 0x3bf   :  { %v238_v41 = vmul.f32 %v237_v40, %v237_v40 }
 0x3c1   :  { %v239_v42 = vsel %vm133_vm2, %v238_v41, 0.0 }
 0x3c2   :  { %240 = vadd.xlane.f32.xlu1 %v239_v42 }
 0x44f   :  { %v241_v43 = vpop.xlane.xlu1 %240 }
 0x450   :  { %v242_v44 = vmul.f32 0.03125, %v241_v43 }
 0x452   :  { %v243_v45 = vadd.f32 1e-05, %v242_v44 }
 0x454   :  { %322 = vrsqrt.f32 %v243_v45 }
 0x45e   :  { %v323_v46 = vpop.eup %322 }
 0x45f   :  { %v245_v48 = vmul.f32 %v323_v46, %v237_v40 }
 0x461   :  { %v253_v50 = vmul.f32 %v288_v47, %v245_v48 }
 0x463   :  { %v261_v51 = vadd.f32 %v289_v49, %v253_v50 }
 0x465   :  { %262 = vst.msk [vmem:[#allocation8] sm:$0xff] %vm133_vm2, %v261_v51 }
 0x466   :  { %401 = shalt.err (!%p398_p0)
}
 0x467   :  { %s402_s16 = scalar_lea.hbm %s560_s9, 128 }
 0x468   :  { %p403_p1 = scmp.ne.s32.totalorder %s560_s9, %s402_s16  ;;  %p406_p2 = scmp.lt.u32.totalorder %s402_s16, %s560_s9 }
 0x46a   :  { %p408_p3 = pnand %p406_p2, %p403_p1 }
 0x46c   :  { %411 = shalt.err (!%p408_p3)
}
 0x46d   :  { %272 = dma.vmem_to_hbm [thread:$0]  %s270_s10, 128, %s560_s9, [#allocation4]  }
 0x46e   :  { %416 = dma.done.wait [#allocation4], 128  }
 0x46f   :  { %417 = vsyncadd [#allocation4], 4294967168 }
 0x470   :  { %276 = vsyncpa [#allocation3], 1 }
 0x471   :  { %277 = vsyncpa [#allocation6], 1 }
 0x472   :  { %278 = vsyncpa [#allocation4], 1 }

</bundles_post_ra>
